<compile_context>
chip_gen: v6e
topology: v6e:2x2x1
jax: 0.10.0
libtpu: 0.0.40
codegen_flags: <defaults>
</compile_context>

<pallas_src>
import functools
import math

import jax
import jax.numpy as jnp
from jax import lax
from jax.experimental import pallas as pl
from jax.experimental.pallas import tpu as pltpu


VMEM_LIMIT = 32 * 1024 * 1024

_ROW_TARGETS = (256, 128, 64, 32, 16, 8)
_COL_TARGETS = (512, 256, 128)


def _tile(dim, targets):
    """Largest target tile that evenly divides `dim`, else the full dim."""
    for t in targets:
        if dim >= t and dim % t == 0:
            return t
    return dim


# ------------------------------ Pallas kernels ------------------------------

def dense_kernel(x_ref, w_ref, b_ref, o_ref, acc_ref, *, activation):
    # y = x @ W + b; W pre-transposed [K, N]; bf16 operands, f32 accumulation.
    @pl.when(pl.program_id(2) == 0)
    def _():
        acc_ref[...] = jnp.zeros_like(acc_ref)

    acc_ref[...] += jnp.dot(x_ref[...], w_ref[...],
                            preferred_element_type=jnp.float32)

    @pl.when(pl.program_id(2) == pl.num_programs(2) - 1)
    def _():
        y = acc_ref[...] + b_ref[...]
        if activation == "gelu":
            # tanh-approx GELU (exact-erf GELU differs by <1e-3); f32 on EUP/VPU
            c = jnp.float32(0.7978845608028654)
            y = 0.5 * y * (1.0 + jnp.tanh(c * (y + 0.044715 * y * y * y)))
        o_ref[...] = y.astype(o_ref.dtype)


def dense_add_ln_kernel(x_ref, w_ref, b_ref, r_ref, g_ref, beta_ref, o_ref,
                        acc_ref, *, eps):
    # Fused: (x @ W + b + residual) -> LayerNorm.  N kept whole (LN needs full row).
    @pl.when(pl.program_id(1) == 0)
    def _():
        acc_ref[...] = jnp.zeros_like(acc_ref)

    acc_ref[...] += jnp.dot(x_ref[...], w_ref[...],
                            preferred_element_type=jnp.float32)

    @pl.when(pl.program_id(1) == pl.num_programs(1) - 1)
    def _():
        y = acc_ref[...] + b_ref[...] + r_ref[...].astype(jnp.float32)
        mu = jnp.mean(y, axis=-1, keepdims=True)
        var = jnp.mean(jnp.square(y - mu), axis=-1, keepdims=True)
        o_ref[...] = ((y - mu) * lax.rsqrt(var + eps) * g_ref[...]
                      + beta_ref[...]).astype(o_ref.dtype)


def ln_kernel(x_ref, g_ref, b_ref, o_ref, *, eps):
    x = x_ref[...].astype(jnp.float32)
    mu = jnp.mean(x, axis=-1, keepdims=True)
    var = jnp.mean(jnp.square(x - mu), axis=-1, keepdims=True)
    o_ref[...] = ((x - mu) * lax.rsqrt(var + eps) * g_ref[...]
                  + b_ref[...]).astype(o_ref.dtype)


def flash_attn_kernel(q_ref, k_ref, v_ref, bias_ref, o_ref,
                      m_sc, l_sc, acc_sc, *, scale):
    # Online-softmax attention.  grid = (B, nH, S//tq, S//tkv); kv axis last.
    # q/k/v tiles are per-head column blocks of the fused [B*S, 3H] QKV matrix.
    kv = pl.program_id(3)

    @pl.when(kv == 0)
    def _():
        m_sc[...] = jnp.full_like(m_sc, -jnp.inf)
        l_sc[...] = jnp.zeros_like(l_sc)
        acc_sc[...] = jnp.zeros_like(acc_sc)

    q = q_ref[...] * scale                                   # bf16, scale folded in
    s = lax.dot_general(q, k_ref[...], (((1,), (1,)), ((), ())),
                        preferred_element_type=jnp.float32)  # (tq, tkv) f32
    s = s + bias_ref[0]                                      # (1, tkv) additive mask

    m_prev = m_sc[...]
    m_new = jnp.maximum(m_prev, jnp.max(s, axis=-1, keepdims=True))
    alpha = jnp.exp(m_prev - m_new)
    p = jnp.exp(s - m_new)
    l_sc[...] = alpha * l_sc[...] + jnp.sum(p, axis=-1, keepdims=True)
    acc_sc[...] = alpha * acc_sc[...] + jnp.dot(
        p.astype(jnp.bfloat16), v_ref[...], preferred_element_type=jnp.float32)
    m_sc[...] = m_new

    @pl.when(kv == pl.num_programs(3) - 1)
    def _():
        o_ref[...] = (acc_sc[...] *
                      pl.reciprocal(l_sc[...], approx=True)).astype(o_ref.dtype)


def lstm_gates_kernel(x_ref, w_ref, b_ref, o_ref, acc_ref):
    # x block (1, ts, tk) of [B, S, Din]; output written time-major per direction.
    @pl.when(pl.program_id(3) == 0)
    def _():
        acc_ref[...] = jnp.zeros_like(acc_ref)

    acc_ref[...] += jnp.dot(x_ref[0], w_ref[...],
                            preferred_element_type=jnp.float32)

    @pl.when(pl.program_id(3) == pl.num_programs(3) - 1)
    def _():
        o_ref[...] = (acc_ref[...] + b_ref[...]).astype(o_ref.dtype)


def bilstm_pool_kernel(gates_hbm, whh_ref, out_ref,
                       gf_buf, gb_buf, sem, h_sc, c_sc, *, seq_len, hidden):
    # Recurrent part of Bi-LSTM 1, fused with mean-pool over tokens.
    #   gates_hbm : [2*S, B, 4H] bf16 in HBM (rows 0..S-1 = forward, S..2S-1 = backward)
    #   whh_ref   : [2, H, 4H] bf16 (W_hh^T, fwd/bwd)
    #   out_ref   : [B, 2H] f32  (mean over tokens of [h_fwd_t | h_bwd_t])
    # Gate slabs are streamed per timestep with double-buffered DMA so VMEM stays
    # a few hundred KB regardless of S (v7x-safe); fwd and bwd steps are interleaved
    # so the second matmul overlaps the first step's sigmoid/tanh work.
    H = hidden

    def start_fetch(t, slot):
        pltpu.make_async_copy(gates_hbm.at[t], gf_buf.at[slot],
                              sem.at[0, slot]).start()
        pltpu.make_async_copy(gates_hbm.at[2 * seq_len - 1 - t], gb_buf.at[slot],
                              sem.at[1, slot]).start()

    start_fetch(0, 0)
    h_sc[...] = jnp.zeros_like(h_sc)
    c_sc[...] = jnp.zeros_like(c_sc)
    out_ref[...] = jnp.zeros_like(out_ref)

    @pl.loop(0, seq_len)
    def _(i):
        slot = i & 1
        pltpu.make_async_copy(gates_hbm.at[0], gf_buf.at[slot],
                              sem.at[0, slot]).wait()
        pltpu.make_async_copy(gates_hbm.at[0], gb_buf.at[slot],
                              sem.at[1, slot]).wait()

        @pl.when(i + 1 < seq_len)
        def _():
            start_fetch(i + 1, 1 - slot)

        def cell(d, g_in):
            # PyTorch LSTM gate order: i, f, g, o.
            h = h_sc[d]
            c = c_sc[d]
            g = g_in.astype(jnp.float32) + jnp.dot(
                h.astype(jnp.bfloat16), whh_ref[d],
                preferred_element_type=jnp.float32)
            ig = jax.nn.sigmoid(g[:, 0:H])
            fg = jax.nn.sigmoid(g[:, H:2 * H])
            gg = jnp.tanh(g[:, 2 * H:3 * H])
            og = jax.nn.sigmoid(g[:, 3 * H:4 * H])
            c_new = fg * c + ig * gg
            h_new = og * jnp.tanh(c_new)
            h_sc[d] = h_new
            c_sc[d] = c_new
            out_ref[:, d * H:(d + 1) * H] += h_new      # running token sum

        cell(0, gf_buf[slot])
        cell(1, gb_buf[slot])

    out_ref[...] = out_ref[...] * (1.0 / seq_len)        # mean over tokens


def bilstm_seq_kernel(gates_ref, whh_ref, out_ref, *, seq_len, hidden):
    # Small fully VMEM-resident Bi-LSTM (used for the second LSTM whose "sequence"
    # is the batch axis, batch size 1).  gates_ref: [T, 8H], out_ref: [T, 2H].
    H = hidden

    def run(d):
        def body(i, carry):
            h, c = carry
            t = i if d == 0 else seq_len - 1 - i
            g = gates_ref[pl.ds(t, 1), pl.ds(4 * H * d, 4 * H)].astype(jnp.float32)
            g = g + jnp.dot(h.astype(jnp.bfloat16), whh_ref[d],
                            preferred_element_type=jnp.float32)
            ig = jax.nn.sigmoid(g[:, 0:H])
            fg = jax.nn.sigmoid(g[:, H:2 * H])
            gg = jnp.tanh(g[:, 2 * H:3 * H])
            og = jax.nn.sigmoid(g[:, 3 * H:4 * H])
            c_new = fg * c + ig * gg
            h_new = og * jnp.tanh(c_new)
            out_ref[pl.ds(t, 1), pl.ds(d * H, H)] = h_new.astype(out_ref.dtype)
            return (h_new, c_new)

        lax.fori_loop(0, seq_len, body,
                      (jnp.zeros((1, H), jnp.float32),
                       jnp.zeros((1, H), jnp.float32)))

    run(0)
    run(1)


def logits_loss_kernel(x_ref, w_ref, b_ref, y_ref, logit_ref, loss_ref,
                       *, smoothing, num_classes):
    # Fused final Linear + label-smoothed cross-entropy (mean over batch).
    z = jnp.dot(x_ref[...], w_ref[...],
                preferred_element_type=jnp.float32) + b_ref[...]
    logit_ref[...] = z
    zs = z - jnp.max(z, axis=-1, keepdims=True)
    logp = zs - jnp.log(jnp.sum(jnp.exp(zs), axis=-1, keepdims=True))
    q = y_ref[...] * (1.0 - smoothing) + smoothing / num_classes
    per_ex = -jnp.sum(q * logp, axis=-1, keepdims=True)              # [B, 1]
    loss_ref[...] = jnp.sum(per_ex, axis=0, keepdims=True) / per_ex.shape[0]


# ------------------------------ Pallas wrappers ------------------------------

def dense(x, w, b, activation=None, out_dtype=jnp.bfloat16):
    """x: [M, K] bf16, w: [K, N] bf16 (pre-transposed), b: [1, N] f32 -> [M, N]."""
    M, K = x.shape
    _, N = w.shape
    tm = _tile(M, _ROW_TARGETS)
    tk = _tile(K, _COL_TARGETS)
    tn = _tile(N, _COL_TARGETS)
    return pl.pallas_call(
        functools.partial(dense_kernel, activation=activation),
        out_shape=jax.ShapeDtypeStruct((M, N), out_dtype),
        grid=(M // tm, N // tn, K // tk),
        in_specs=[pl.BlockSpec((tm, tk), lambda i, j, k: (i, k)),
                  pl.BlockSpec((tk, tn), lambda i, j, k: (k, j)),
                  pl.BlockSpec((1, tn), lambda i, j, k: (0, j))],
        out_specs=pl.BlockSpec((tm, tn), lambda i, j, k: (i, j)),
        scratch_shapes=[pltpu.VMEM((tm, tn), jnp.float32)],
        compiler_params=pltpu.CompilerParams(
            dimension_semantics=("parallel", "parallel", "arbitrary"),
            vmem_limit_bytes=VMEM_LIMIT),
    )(x, w, b)


def dense_add_ln(x, w, b, residual, gamma, beta, eps=1e-12):
    """Fused (x @ w + b + residual) -> LayerNorm.  bf16 in/out, f32 LN math."""
    M, K = x.shape
    _, N = w.shape
    tm = _tile(M, _ROW_TARGETS)
    tk = _tile(K, _COL_TARGETS)
    return pl.pallas_call(
        functools.partial(dense_add_ln_kernel, eps=eps),
        out_shape=jax.ShapeDtypeStruct((M, N), jnp.bfloat16),
        grid=(M // tm, K // tk),
        in_specs=[pl.BlockSpec((tm, tk), lambda i, k: (i, k)),
                  pl.BlockSpec((tk, N), lambda i, k: (k, 0)),
                  pl.BlockSpec((1, N), lambda i, k: (0, 0)),
                  pl.BlockSpec((tm, N), lambda i, k: (i, 0)),
                  pl.BlockSpec((1, N), lambda i, k: (0, 0)),
                  pl.BlockSpec((1, N), lambda i, k: (0, 0))],
        out_specs=pl.BlockSpec((tm, N), lambda i, k: (i, 0)),
        scratch_shapes=[pltpu.VMEM((tm, N), jnp.float32)],
        compiler_params=pltpu.CompilerParams(
            dimension_semantics=("parallel", "arbitrary"),
            vmem_limit_bytes=VMEM_LIMIT),
    )(x, w, b, residual, gamma, beta)


def layernorm(x, g, b, eps=1e-12):
    M, H = x.shape
    tm = _tile(M, _ROW_TARGETS)
    return pl.pallas_call(
        functools.partial(ln_kernel, eps=eps),
        out_shape=jax.ShapeDtypeStruct((M, H), jnp.bfloat16),
        grid=(M // tm,),
        in_specs=[pl.BlockSpec((tm, H), lambda i: (i, 0)),
                  pl.BlockSpec((1, H), lambda i: (0, 0)),
                  pl.BlockSpec((1, H), lambda i: (0, 0))],
        out_specs=pl.BlockSpec((tm, H), lambda i: (i, 0)),
        compiler_params=pltpu.CompilerParams(dimension_semantics=("parallel",)),
    )(x, g, b)


def flash_attention(qkv, bias, B, S, nH, dH):
    """qkv: [B*S, 3H] bf16 (fused QKV projection, head-major within each slab),
    bias: [B, 1, S] f32 additive mask  ->  context [B*S, H] bf16 (heads concatenated).
    Q/K/V tiles are read straight out of `qkv` via index maps (no HBM relayout)."""
    H = nH * dH
    scale = 1.0 / math.sqrt(dH)
    tq = _tile(S, (256, 128, 64, 32, 16, 8))
    tkv = S if S <= 512 else _tile(S, (512, 256, 128))
    nq = S // tq
    nkv = S // tkv
    return pl.pallas_call(
        functools.partial(flash_attn_kernel, scale=scale),
        out_shape=jax.ShapeDtypeStruct((B * S, H), jnp.bfloat16),
        grid=(B, nH, nq, nkv),
        in_specs=[
            pl.BlockSpec((tq, dH), lambda b, h, qi, ki: (b * nq + qi, h)),
            pl.BlockSpec((tkv, dH), lambda b, h, qi, ki: (b * nkv + ki, nH + h)),
            pl.BlockSpec((tkv, dH), lambda b, h, qi, ki: (b * nkv + ki, 2 * nH + h)),
            pl.BlockSpec((1, 1, tkv), lambda b, h, qi, ki: (b, 0, ki)),
        ],
        out_specs=pl.BlockSpec((tq, dH), lambda b, h, qi, ki: (b * nq + qi, h)),
        scratch_shapes=[pltpu.VMEM((tq, 1), jnp.float32),
                        pltpu.VMEM((tq, 1), jnp.float32),
                        pltpu.VMEM((tq, dH), jnp.float32)],
        compiler_params=pltpu.CompilerParams(
            dimension_semantics=("parallel", "parallel", "parallel", "arbitrary"),
            vmem_limit_bytes=VMEM_LIMIT),
    )(qkv, qkv, qkv, bias)


def lstm_gates_timemajor(x, wih, b, B, S, hidden):
    """Input projection of the Bi-LSTM for BOTH directions in one matmul whose
    out_specs emit a time-major, per-direction-contiguous layout.

    x  : [B*S, Din] bf16       wih: [Din, 8H] bf16 (cols [fwd 4H | bwd 4H])
    b  : [1, 8H] f32 (b_ih + b_hh folded)
    returns gates [2*S, B, 4H] bf16 (rows 0..S-1 forward, S..2S-1 backward).
    """
    Din = x.shape[1]
    H4 = 4 * hidden
    x3 = x.reshape(B, S, Din)
    ts = _tile(S, (256, 128, 64, 32, 16, 8))
    tk = _tile(Din, _COL_TARGETS)
    ns = S // ts
    out = pl.pallas_call(
        lstm_gates_kernel,
        out_shape=jax.ShapeDtypeStruct((2 * S, B * H4), jnp.bfloat16),
        grid=(2, B, ns, Din // tk),
        in_specs=[pl.BlockSpec((1, ts, tk), lambda d, b_, s, k: (b_, s, k)),
                  pl.BlockSpec((tk, H4), lambda d, b_, s, k: (k, d)),
                  pl.BlockSpec((1, H4), lambda d, b_, s, k: (0, d))],
        out_specs=pl.BlockSpec((ts, H4), lambda d, b_, s, k: (d * ns + s, b_)),
        scratch_shapes=[pltpu.VMEM((ts, H4), jnp.float32)],
        compiler_params=pltpu.CompilerParams(
            dimension_semantics=("parallel", "parallel", "parallel", "arbitrary"),
            vmem_limit_bytes=VMEM_LIMIT),
    )(x3, wih, b)
    return out.reshape(2 * S, B, H4)


def bilstm_mean_pool(x2d, wih, b, whh, B, S, hidden):
    """Bi-LSTM over [B, S, Din] fused with mean pooling over tokens -> [B, 2H] f32."""
    gates = lstm_gates_timemajor(x2d, wih, b, B, S, hidden)      # [2*S, B, 4H] bf16
    return pl.pallas_call(
        functools.partial(bilstm_pool_kernel, seq_len=S, hidden=hidden),
        out_shape=jax.ShapeDtypeStruct((B, 2 * hidden), jnp.float32),
        grid=(1,),
        in_specs=[pl.BlockSpec(memory_space=pl.ANY),              # gates stay in HBM
                  pl.BlockSpec((2, hidden, 4 * hidden), lambda i: (0, 0, 0))],
        out_specs=pl.BlockSpec((B, 2 * hidden), lambda i: (0, 0)),
        scratch_shapes=[pltpu.VMEM((2, B, 4 * hidden), jnp.bfloat16),
                        pltpu.VMEM((2, B, 4 * hidden), jnp.bfloat16),
                        pltpu.SemaphoreType.DMA((2, 2)),
                        pltpu.VMEM((2, B, hidden), jnp.float32),
                        pltpu.VMEM((2, B, hidden), jnp.float32)],
        compiler_params=pltpu.CompilerParams(
            dimension_semantics=("arbitrary",),
            vmem_limit_bytes=VMEM_LIMIT),
    )(gates, whh)


def bilstm_seq(x, wih, b, whh, hidden):
    """Small Bi-LSTM over a length-T sequence with batch 1.  x: [T, Din] -> [T, 2H]."""
    T = x.shape[0]
    gates = dense(x, wih, b)                                      # [T, 8H] bf16
    return pl.pallas_call(
        functools.partial(bilstm_seq_kernel, seq_len=T, hidden=hidden),
        out_shape=jax.ShapeDtypeStruct((T, 2 * hidden), jnp.bfloat16),
        grid=(1,),
        in_specs=[pl.BlockSpec((T, 8 * hidden), lambda i: (0, 0)),
                  pl.BlockSpec((2, hidden, 4 * hidden), lambda i: (0, 0, 0))],
        out_specs=pl.BlockSpec((T, 2 * hidden), lambda i: (0, 0)),
        compiler_params=pltpu.CompilerParams(vmem_limit_bytes=VMEM_LIMIT),
    )(gates, whh)


def logits_and_loss(x, w, b, onehot, smoothing, num_classes):
    """Fused final Linear + label-smoothed CE.  Returns (logits [B,C] f32, loss)."""
    B, K = x.shape
    C = num_classes
    logits, loss = pl.pallas_call(
        functools.partial(logits_loss_kernel, smoothing=smoothing,
                          num_classes=num_classes),
        out_shape=(jax.ShapeDtypeStruct((B, C), jnp.float32),
                   jax.ShapeDtypeStruct((1, 1), jnp.float32)),
        grid=(1,),
        in_specs=[pl.BlockSpec((B, K), lambda i: (0, 0)),
                  pl.BlockSpec((K, C), lambda i: (0, 0)),
                  pl.BlockSpec((1, C), lambda i: (0, 0)),
                  pl.BlockSpec((B, C), lambda i: (0, 0))],
        out_specs=(pl.BlockSpec((B, C), lambda i: (0, 0)),
                   pl.BlockSpec((1, 1), lambda i: (0, 0))),
        compiler_params=pltpu.CompilerParams(dimension_semantics=("arbitrary",)),
    )(x, w, b, onehot)
    return logits, loss[0, 0]


# ------------------------------ model (glue) ------------------------------

def init_params(key, cfg):
    H, I = cfg["hidden"], cfg["intermediate"]
    HL = cfg["lstm_hidden"]
    keys = iter(jax.random.split(key, 64))

    def nrm(shape, scale=0.02, dtype=jnp.bfloat16):
        return (scale * jax.random.normal(next(keys), shape,
                                          dtype=jnp.float32)).astype(dtype)

    p = {
        "word_emb": nrm((cfg["vocab"], H), dtype=jnp.float32),
        "pos_emb": nrm((cfg["max_pos"], H), dtype=jnp.float32),
        "type_emb": nrm((2, H), dtype=jnp.float32),
        "emb_ln_g": jnp.ones((1, H), jnp.float32),
        "emb_ln_b": jnp.zeros((1, H), jnp.float32),
        "layers": [],
    }
    for _ in range(cfg["num_layers"]):
        p["layers"].append({
            # fused QKV projection; all matmul weights bf16, pre-transposed [K, N]
            "qkv_w": nrm((H, 3 * H)), "qkv_b": jnp.zeros((1, 3 * H), jnp.float32),
            "o_w": nrm((H, H)), "o_b": jnp.zeros((1, H), jnp.float32),
            "ln1_g": jnp.ones((1, H), jnp.float32), "ln1_b": jnp.zeros((1, H), jnp.float32),
            "i_w": nrm((H, I)), "i_b": jnp.zeros((1, I), jnp.float32),
            "f_w": nrm((I, H)), "f_b": jnp.zeros((1, H), jnp.float32),
            "ln2_g": jnp.ones((1, H), jnp.float32), "ln2_b": jnp.zeros((1, H), jnp.float32),
        })
    # Bi-LSTM 1: input = bert hidden size; Bi-LSTM 2: input = 2*HL.
    # A checkpoint loader must store W_ih^T / W_hh^T (bf16) and sum b_ih + b_hh.
    for name, din in (("lstm1", H), ("lstm2", 2 * HL)):
        p[f"{name}_wih"] = nrm((din, 8 * HL), 0.05)     # [fwd 4H | bwd 4H] W_ih^T
        p[f"{name}_whh"] = nrm((2, HL, 4 * HL), 0.05)   # stacked [fwd, bwd] W_hh^T
        p[f"{name}_b"] = jnp.zeros((1, 8 * HL), jnp.float32)
    p["out_w"] = nrm((2 * HL, cfg["num_classes"]))
    p["out_b"] = jnp.zeros((1, cfg["num_classes"]), jnp.float32)
    return p


def bert_layer(x2d, bias, lp, B, S, nH, dH):
    qkv = dense(x2d, lp["qkv_w"], lp["qkv_b"])                     # [B*S, 3H] bf16
    ctx = flash_attention(qkv, bias, B, S, nH, dH)                 # [B*S, H]  bf16
    # fused: output projection + residual + LayerNorm
    x2d = dense_add_ln(ctx, lp["o_w"], lp["o_b"], x2d, lp["ln1_g"], lp["ln1_b"])
    # FFN: GELU dense, then fused dense + residual + LayerNorm
    inter = dense(x2d, lp["i_w"], lp["i_b"], activation="gelu")
    x2d = dense_add_ln(inter, lp["f_w"], lp["f_b"], x2d, lp["ln2_g"], lp["ln2_b"])
    return x2d


def forward(params, cfg, input_ids, attention_mask, labels=None):
    B, S = input_ids.shape
    H, nH = cfg["hidden"], cfg["num_heads"]
    dH = H // nH
    HL = cfg["lstm_hidden"]

    # --- synthetic BERT encoder (stands in for the pretrained BertModel) ---
    # embedding-table gathers left to XLA (no clean BlockSpec equivalent)
    emb = (params["word_emb"][input_ids]
           + params["pos_emb"][:S][None, :, :]
           + params["type_emb"][0][None, None, :])                 # f32 [B, S, H]
    x2d = layernorm(emb.reshape(B * S, H), params["emb_ln_g"], params["emb_ln_b"])
    bias = ((1.0 - attention_mask.astype(jnp.float32)) * -10000.0)[:, None, :]  # [B,1,S]
    for lp in params["layers"]:
        x2d = bert_layer(x2d, bias, lp, B, S, nH, dH)

    # dropout(0.2): identity in eval/inference mode
    # Bi-LSTM 1 fused with mean over tokens (matches torch.mean(lstm_out, dim=1),
    # including padded positions, as in the reference).
    pooled = bilstm_mean_pool(x2d, params["lstm1_wih"], params["lstm1_b"],
                              params["lstm1_whh"], B, S, HL)       # [B, 2HL] f32
    # unsqueeze(0) + dropout2(0.2): LSTM 2 sees a length-B "sequence", batch 1
    lstm2_out = bilstm_seq(pooled.astype(jnp.bfloat16), params["lstm2_wih"],
                           params["lstm2_b"], params["lstm2_whh"], HL)  # [B, 2HL]

    if labels is not None:
        onehot = jax.nn.one_hot(labels, cfg["num_classes"], dtype=jnp.float32)
        logits, loss = logits_and_loss(lstm2_out, params["out_w"], params["out_b"],
                                       onehot, cfg["smoothing"], cfg["num_classes"])
        return (loss, logits)
    logits = dense(lstm2_out, params["out_w"], params["out_b"],
                   out_dtype=jnp.float32)                          # [B, C]
    return (logits,)


if __name__ == "__main__":
    cfg = dict(vocab=64, max_pos=32, hidden=256, num_heads=2, intermediate=512,
               num_layers=2, num_classes=4, lstm_hidden=128, smoothing=0.2)
    key = jax.random.PRNGKey(0)
    pkey, dkey = jax.random.split(key)
    params = init_params(pkey, cfg)

    B, S = 2, 8
    input_ids = jax.random.randint(dkey, (B, S), 0, cfg["vocab"], dtype=jnp.int32)
    attention_mask = jnp.array([[1] * 8, [1] * 6 + [0] * 2], dtype=jnp.float32)
    labels = jnp.array([1, 3], dtype=jnp.int32)

    loss, logits = forward(params, cfg, input_ids, attention_mask, labels=labels)
    (logits_only,) = forward(params, cfg, input_ids, attention_mask)
    jax.block_until_ready((loss, logits, logits_only))

    assert logits.shape == (B, cfg["num_classes"])
    assert logits_only.shape == (B, cfg["num_classes"])
    assert loss.shape == ()
    assert bool(jnp.isfinite(loss))
    # TODO(synk): pretrained BertModel weights are not loadable here; a synthetic BERT
    # encoder with the same structure stands in (a checkpoint loader must transpose
    # Linear weights to [K,N] bf16 and sum LSTM b_ih+b_hh into one bias).
    print("KERNEL_OK")
</pallas_src>

<mosaic_0001>
module attributes {stable_mosaic.version = 11 : i64} {
  func.func @ln_kernel(%arg0: i32, %arg1: memref<16x256xf32, #tpu.memory_space<vmem>>, %arg2: memref<1x256xf32, #tpu.memory_space<vmem>>, %arg3: memref<1x256xf32, #tpu.memory_space<vmem>>, %arg4: memref<16x256xbf16, #tpu.memory_space<vmem>>) attributes {dimension_semantics = [#tpu.dimension_semantics<parallel>], iteration_bounds = array<i64: 1>, scalar_prefetch = 0 : i64, scratch_operands = 0 : i64, tpu.core_type = #tpu.core_type<tc>, window_params = [{transform_indices = @transform_0, window_bounds = array<i64: 16, 256>}, {pipeline_mode = #tpu.pipeline_mode<synchronous>, transform_indices = @transform_1, window_bounds = array<i64: 1, 256>}, {pipeline_mode = #tpu.pipeline_mode<synchronous>, transform_indices = @transform_2, window_bounds = array<i64: 1, 256>}, {transform_indices = @transform_3, window_bounds = array<i64: 16, 256>}]} {
    %c0 = arith.constant 0 : index
    %c0_0 = arith.constant 0 : index
    %0 = vector.load %arg1[%c0, %c0_0] : memref<16x256xf32, #tpu.memory_space<vmem>>, vector<16x256xf32>
    %cst = arith.constant dense<0.000000e+00> : vector<16xf32>
    %1 = vector.multi_reduction <add>, %0, %cst [1] : vector<16x256xf32> to vector<16xf32>
    %2 = vector.shape_cast %1 : vector<16xf32> to vector<16x1xf32>
    %cst_1 = arith.constant 2.560000e+02 : f32
    %3 = vector.broadcast %cst_1 : f32 to vector<16x1xf32>
    %4 = arith.divf %2, %3 : vector<16x1xf32>
    %5 = vector.broadcast %4 : vector<16x1xf32> to vector<16x256xf32>
    %6 = arith.subf %0, %5 : vector<16x256xf32>
    %7 = arith.mulf %6, %6 : vector<16x256xf32>
    %cst_2 = arith.constant dense<0.000000e+00> : vector<16xf32>
    %8 = vector.multi_reduction <add>, %7, %cst_2 [1] : vector<16x256xf32> to vector<16xf32>
    %9 = vector.shape_cast %8 : vector<16xf32> to vector<16x1xf32>
    %cst_3 = arith.constant 2.560000e+02 : f32
    %10 = vector.broadcast %cst_3 : f32 to vector<16x1xf32>
    %11 = arith.divf %9, %10 : vector<16x1xf32>
    %12 = vector.broadcast %4 : vector<16x1xf32> to vector<16x256xf32>
    %13 = arith.subf %0, %12 : vector<16x256xf32>
    %cst_4 = arith.constant 9.99999996E-13 : f32
    %14 = vector.broadcast %cst_4 : f32 to vector<16x1xf32>
    %15 = arith.addf %11, %14 : vector<16x1xf32>
    %16 = math.rsqrt %15 : vector<16x1xf32>
    %17 = vector.broadcast %16 : vector<16x1xf32> to vector<16x256xf32>
    %18 = arith.mulf %13, %17 : vector<16x256xf32>
    %c0_5 = arith.constant 0 : index
    %c0_6 = arith.constant 0 : index
    %19 = vector.load %arg2[%c0_5, %c0_6] : memref<1x256xf32, #tpu.memory_space<vmem>>, vector<1x256xf32>
    %20 = vector.broadcast %19 : vector<1x256xf32> to vector<16x256xf32>
    %21 = arith.mulf %18, %20 : vector<16x256xf32>
    %c0_7 = arith.constant 0 : index
    %c0_8 = arith.constant 0 : index
    %22 = vector.load %arg3[%c0_7, %c0_8] : memref<1x256xf32, #tpu.memory_space<vmem>>, vector<1x256xf32>
    %23 = vector.broadcast %22 : vector<1x256xf32> to vector<16x256xf32>
    %24 = arith.addf %21, %23 : vector<16x256xf32>
    %25 = arith.truncf %24 : vector<16x256xf32> to vector<16x256xbf16>
    %c0_9 = arith.constant 0 : index
    %c0_10 = arith.constant 0 : index
    %26 = vector.load %arg4[%c0_9, %c0_10] : memref<16x256xbf16, #tpu.memory_space<vmem>>, vector<16x256xbf16>
    tpu.vector_store %arg4[%c0_9, %c0_10], %25 {strides = array<i32>} : memref<16x256xbf16, #tpu.memory_space<vmem>>, vector<16x256xbf16>,
    return
  }
  func.func @transform_0(%arg0: i32) -> (i32, i32) {
    %c0_i32 = arith.constant 0 : i32
    %c0_i32_0 = arith.constant 0 : i32
    return %arg0, %c0_i32 : i32, i32
  }
  func.func @transform_1(%arg0: i32) -> (i32, i32) {
    %c0_i32 = arith.constant 0 : i32
    %c0_i32_0 = arith.constant 0 : i32
    %c0_i32_1 = arith.constant 0 : i32
    return %c0_i32, %c0_i32_0 : i32, i32
  }
  func.func @transform_2(%arg0: i32) -> (i32, i32) {
    %c0_i32 = arith.constant 0 : i32
    %c0_i32_0 = arith.constant 0 : i32
    %c0_i32_1 = arith.constant 0 : i32
    return %c0_i32, %c0_i32_0 : i32, i32
  }
  func.func @transform_3(%arg0: i32) -> (i32, i32) {
    %c0_i32 = arith.constant 0 : i32
    %c0_i32_0 = arith.constant 0 : i32
    return %arg0, %c0_i32 : i32, i32
  }
}

</mosaic_0001>

<bundles_post_ra>
// kernel: tpu_custom_call.1
= control target key start
LH: loop header
LB: loop body
LE: loop exit
PB: predicated region body
PF: predicated region fallthrough
CT: control target
= control target key end

     0   :  { %8 = vsyncpa [#allocation3], 0  ;;  %s262_s0 = inlined_call_operand.hbm [shape: f32[16,256], index: 0, kind: input, shape index: {}]   ;;  %s263_s1 = inlined_call_operand.hbm [shape: f32[1,256], index: 1, kind: input, shape index: {}]   ;;  %s264_s2 = inlined_call_operand.vmem [shape: f32[1,256], index: 2, kind: input, shape index: {}]   ;;  %s265_s3 = inlined_call_operand.hbm [shape: bf16[16,256], index: 3, kind: output, shape index: {}]  }
   0x1   :  { %9 = vsyncpa [#allocation6], 0 }
   0x2   :  { %10 = vsyncpa [#allocation4], 0  ;;  %s223_s12 = smov [#allocation2]  }
   0x3   :  { %s16_s13 = sshll.u32 %s223_s12, 4  ;;  %s17_s13 = int_to_ptr.vmem [resolvable:$true] %s16_s13 }
   0x4   :  { %s165_s14 = scalar_lea.vmem %s17_s13, 512  ;;  %p170_p1 = scmp.lt.s32.totalorder %s17_s13, %s17_s13 }
   0x5   :  { %p166_p0 = scmp.ne.s32.totalorder %s17_s13, %s165_s14  ;;  %p171_p2 = scmp.lt.s32.totalorder %s165_s14, %s165_s14 }
   0x7   :  { %p172_p3 = por %p171_p2, %p170_p1 }
   0x9   :  { %p173_p4 = pnand %p172_p3, %p166_p0 }
   0xb   :  { %176 = shalt.err (!%p173_p4)
}
   0xc   :  { %s224_s15 = smov 256   ;;  %s225_s16 = smov 16  }
   0xd   :  { %22 = dma.hbm_to_vmem [thread:$0]  %s262_s0, 512, %s17_s13, [#allocation3], %s224_s15, %s224_s15, %s225_s16  }
   0xe   :  { %s226_s19 = smov [#allocation5]  }
   0xf   :  { %s29_s20 = sshll.u32 %s226_s19, 4  ;;  %s30_s20 = int_to_ptr.vmem [resolvable:$true] %s29_s20 }
  0x10   :  { %s185_s21 = scalar_lea.vmem %s30_s20, 32  ;;  %p190_p6 = scmp.lt.s32.totalorder %s30_s20, %s30_s20 }
  0x11   :  { %p186_p5 = scmp.ne.s32.totalorder %s30_s20, %s185_s21  ;;  %p191_p7 = scmp.lt.s32.totalorder %s185_s21, %s185_s21 }
  0x13   :  { %p192_p8 = por %p191_p7, %p190_p6 }
  0x15   :  { %p193_p9 = pnand %p192_p8, %p186_p5 }
  0x17   :  { %196 = shalt.err (!%p193_p9)
}
  0x18   :  { %32 = dma.hbm_to_vmem [thread:$0]  %s263_s1, 32, %s30_s20, [#allocation6]  }
  0x19   :  { %217 = dma.done.wait [#allocation3], 512  }
  0x1a   :  { %218 = vsyncadd [#allocation3], 4294966784 }
  0x1b   :  { %219 = dma.done.wait [#allocation6], 32  }
  0x1c   :  { %220 = vsyncadd [#allocation6], 4294967264  ;;  %v41_v0 = vld [vmem:[#allocation2] sm:$0xff]  ;;  %v42_v1 = vld [vmem:[#allocation2 + $0x8] sm:$0xff]  ;;  %v80_v25 = vlaneseq  ;;  %s227_s24 = smov [#allocation7]  }
  0x1d   :  { %v43_v2 = vld [vmem:[#allocation2 + $0x10] sm:$0xff]  ;;  %v45_v3 = vadd.f32 %v42_v1, %v41_v0  ;;  %v44_v4 = vld [vmem:[#allocation2 + $0x18] sm:$0xff]  ;;  %v78_v30 = vld [vmem:[#allocation5] sm:$0x3]  ;;  %s129_s25 = sshll.u32 %s227_s24, 4  ;;  %s130_s25 = int_to_ptr.vmem [resolvable:$true] %s129_s25 }
  0x1e   :  { %v48_v5 = vadd.f32 %v44_v4, %v43_v2  ;;  %v81_v27 = vshrl.u32 %v80_v25, 7  ;;  %v94_v31 = vld [vmem:[%s264_s2] sm:$0x3]  ;;  %s197_s2 = scalar_lea.vmem %s130_s25, 256  ;;  %p202_p11 = scmp.lt.s32.totalorder %s130_s25, %s130_s25 }
  0x1f   :  { %46 = vadd.xlane.f32.xlu0 %v45_v3  ;;  %p198_p10 = scmp.ne.s32.totalorder %s130_s25, %s197_s2  ;;  %p203_p12 = scmp.lt.s32.totalorder %s197_s2, %s197_s2 }
  0x20   :  { %v82_v28 = vsub.s32 0, %v81_v27  ;;  %v86_v29 = vsub.s32 1, %v81_v27 }
  0x21   :  { %p204_p13 = por %p203_p12, %p202_p11 }
  0x22   :  { %v83_v32 = vrot.slane %v78_v30, %v82_v28  ;;  %v87_v33 = vrot.slane %v78_v30, %v86_v29  ;;  %v99_v37 = vrot.slane %v94_v31, %v82_v28  ;;  %v103_v38 = vrot.slane %v94_v31, %v86_v29 }
  0x23   :  { %49 = vadd.xlane.f32.xlu0 %v48_v5  ;;  %p205_p0 = pnand %p204_p13, %p198_p10 }
  0xa8   :  { %v47_v6 = vpop.xlane.xlu0 %46 }
  0xa9   :  { %v52_v7 = vmul.f32 0.00390625, %v47_v6 }
  0xab   :  { %v54_v8 = vsub.f32 %v41_v0, %v52_v7  ;;  %v55_v9 = vsub.f32 %v42_v1, %v52_v7 }
  0xac   :  { %v50_v10 = vpop.xlane.xlu0 %49 }
  0xad   :  { %v53_v11 = vmul.f32 0.00390625, %v50_v10  ;;  %v58_v12 = vmul.f32 %v54_v8, %v54_v8  ;;  %v59_v13 = vmul.f32 %v55_v9, %v55_v9 }
  0xaf   :  { %v56_v14 = vsub.f32 %v43_v2, %v53_v11  ;;  %v57_v15 = vsub.f32 %v44_v4, %v53_v11  ;;  %v62_v16 = vadd.f32 %v59_v13, %v58_v12 }
  0xb1   :  { %63 = vadd.xlane.f32.xlu1 %v62_v16  ;;  %v60_v17 = vmul.f32 %v56_v14, %v56_v14  ;;  %v61_v18 = vmul.f32 %v57_v15, %v57_v15 }
  0xb3   :  { %v65_v19 = vadd.f32 %v61_v18, %v60_v17 }
  0xb5   :  { %66 = vadd.xlane.f32.xlu1 %v65_v19 }
 0x13a   :  { %v64_v20 = vpop.xlane.xlu1 %63 }
 0x13b   :  { %v68_v21 = vmul.f32 0.00390625, %v64_v20 }
 0x13d   :  { %v70_v22 = vadd.f32 1e-12, %v68_v21 }
 0x13e   :  { %v67_v23 = vpop.xlane.xlu1 %66 }
 0x13f   :  { %153 = vrsqrt.f32 %v70_v22  ;;  %v69_v24 = vmul.f32 0.00390625, %v67_v23 }
 0x141   :  { %v71_v26 = vadd.f32 1e-12, %v69_v24 }
 0x143   :  { %155 = vrsqrt.f32 %v71_v26 }
 0x14c   :  { %v154_v34 = vpop.eup %153 }
 0x14d   :  { %v74_v35 = vmul.f32 %v154_v34, %v54_v8  ;;  %v75_v36 = vmul.f32 %v154_v34, %v55_v9 }
 0x14f   :  { %v90_v39 = vmul.f32 %v83_v32, %v74_v35  ;;  %v91_v40 = vmul.f32 %v87_v33, %v75_v36 }
 0x150   :  { %v156_v41 = vpop.eup %155 }
 0x151   :  { %v76_v42 = vmul.f32 %v156_v41, %v56_v14  ;;  %v77_v43 = vmul.f32 %v156_v41, %v57_v15  ;;  %v106_v44 = vadd.f32 %v99_v37, %v90_v39  ;;  %v107_v45 = vadd.f32 %v103_v38, %v91_v40 }
 0x153   :  { %v92_v46 = vmul.f32 %v83_v32, %v76_v42  ;;  %v93_v47 = vmul.f32 %v87_v33, %v77_v43  ;;  %v144_v48 = vpack.c.bf16 %v107_v45, %v106_v44 }
 0x155   :  { %v108_v49 = vadd.f32 %v99_v37, %v92_v46  ;;  %v109_v50 = vadd.f32 %v103_v38, %v93_v47  ;;  %122 = vst [vmem:[#allocation7] sm:$0xff] %v144_v48 }
 0x157   :  { %v145_v51 = vpack.c.bf16 %v109_v50, %v108_v49 }
 0x159   :  { %123 = vst [vmem:[#allocation7 + $0x8] sm:$0xff] %v145_v51 }
 0x15a   :  { %208 = shalt.err (!%p205_p0)
}
 0x15b   :  { %s228_s26 = smov 128   ;;  %s229_s27 = smov 8  }
 0x15c   :  { %135 = dma.vmem_to_hbm [thread:$0]  %s130_s25, 256, %s265_s3, [#allocation4], %s228_s26, %s228_s26, %s229_s27  }
 0x15d   :  { %221 = dma.done.wait [#allocation4], 256  }
 0x15e   :  { %222 = vsyncadd [#allocation4], 4294967040 }
 0x15f   :  { %139 = vsyncpa [#allocation3], 1 }
 0x160   :  { %140 = vsyncpa [#allocation6], 1 }
 0x161   :  { %141 = vsyncpa [#allocation4], 1 }

</bundles_post_ra>
